<compile_context>
chip_gen: v5e
topology: v5e:2x2
jax: 0.10.0
libtpu: 0.0.40
codegen_flags: <defaults>
</compile_context>

<pallas_src>
import functools

import jax
import jax.numpy as jnp
from jax.experimental import pallas as pl
from jax.experimental.pallas import tpu as pltpu


def _gine_combine_kernel(w_ref, x_ref, o_ref, *, K, F):
    """Weighted reduction over the hop axis.

    w_ref : SMEM ref, shape (1, K), f32  -- precomputed (1 + eps)
    x_ref : VMEM ref, shape (TN, K*F)    -- current tile of flattened x
    o_ref : VMEM ref, shape (TN, F)      -- output tile
    """
    # K is tiny and static: fully unrolled FMA chain on the VPU. Per-hop slices
    # are static, lane-contiguous windows of the flattened row.
    acc = w_ref[0, 0] * x_ref[:, 0:F].astype(jnp.float32)
    for k in range(1, K):
        acc = acc + w_ref[0, k] * x_ref[:, k * F:(k + 1) * F].astype(jnp.float32)
    o_ref[...] = acc.astype(o_ref.dtype)


def gine_plus_combine(x, eps, *, tile_n=None,
                      vmem_budget_bytes=20 * 1024 * 1024):
    """x: [N, K, F], eps: [1, K]  ->  [N, F]"""
    N, K, F = x.shape

    # Precompute (1 + eps) once, in f32 (keeps the add exact even if eps is bf16).
    w = (1.0 + eps.astype(jnp.float32)).reshape(1, K)

    # Flatten (K, F) -> K*F: free row-major reshape, no transpose. tile_n lands
    # on sublanes, K*F on lanes -> clean DMA, zero sublane padding for K.
    x_flat = x.reshape(N, K * F)

    itemsize = jnp.dtype(x.dtype).itemsize
    sublane = {4: 8, 2: 16, 1: 32}.get(itemsize, 8)

    # Double-buffered VMEM per grid step: 2 * (input block) + 2 * (output block).
    per_row_bytes = 2 * (K * F + F) * itemsize
    if tile_n is None:
        tile_n = vmem_budget_bytes // per_row_bytes
        tile_n = min(tile_n, 2048)
    # Align the tile to the sublane granule and don't exceed the (padded) problem.
    tile_n = max(sublane, (tile_n // sublane) * sublane)
    tile_n = min(tile_n, max(sublane, ((N + sublane - 1) // sublane) * sublane))

    # Ragged N: pad up to a multiple of tile_n; padded rows are computed but
    # discarded, so semantics are unchanged and tile_n stays bandwidth-optimal.
    n_pad = (-N) % tile_n
    if n_pad:
        x_flat = jnp.pad(x_flat, ((0, n_pad), (0, 0)))
    n_padded = N + n_pad
    grid = (n_padded // tile_n,)

    # TODO(synk): for very large F (>1024), add a second grid axis tiling F in
    # 128-multiples to keep the per-block VMEM bounded on v7x.

    out = pl.pallas_call(
        functools.partial(_gine_combine_kernel, K=K, F=F),
        out_shape=jax.ShapeDtypeStruct((n_padded, F), x.dtype),
        grid_spec=pltpu.PrefetchScalarGridSpec(
            num_scalar_prefetch=0,
            grid=grid,
            in_specs=[
                # (1 + eps) is tiny: keep it whole in SMEM for scalar reads.
                pl.BlockSpec(memory_space=pltpu.MemorySpace.SMEM),
                # Flattened x: tile the N axis, carry the full K*F lane extent.
                pl.BlockSpec((tile_n, K * F), lambda i: (i, 0)),
            ],
            out_specs=pl.BlockSpec((tile_n, F), lambda i: (i, 0)),
        ),
        compiler_params=pltpu.CompilerParams(
            dimension_semantics=("parallel",),
            # Raise scoped VMEM above the v5e default (16 MiB) so the large,
            # double-buffered tiles fit; stays well under v7x's 64 MiB physical.
            vmem_limit_bytes=40 * 1024 * 1024,
        ),
    )(w, x_flat)

    return out[:N] if n_pad else out


if __name__ == "__main__":
    # Small shapes consistent with the module: N nodes, K hops, F features.
    # N is deliberately non-divisible to exercise the ragged-N padding path.
    N, K, F = 37, 4, 128

    key = jax.random.PRNGKey(0)
    x = jax.random.normal(key, (N, K, F), dtype=jnp.float32)

    # Deterministic parameter init, exactly as in __init__ / reset_parameters:
    # eps = zeros of shape [1, K].
    eps = jnp.zeros((1, K), dtype=jnp.float32)

    out = gine_plus_combine(x, eps)
    out = jax.block_until_ready(out)

    # Pure-JAX reference of the PyTorch forward.
    ref = jnp.sum((1.0 + eps[:, :, None]) * x, axis=1)
    assert out.shape == (N, F)
    assert jnp.allclose(out, ref, atol=1e-5, rtol=1e-5), "mismatch vs reference"

    print("KERNEL_OK")
</pallas_src>

<mosaic_0001>
module attributes {stable_mosaic.version = 11 : i64} {
  func.func @_gine_combine_kernel(%arg0: i32, %arg1: memref<1x4xf32, #tpu.memory_space<smem>>, %arg2: memref<40x512xf32, #tpu.memory_space<vmem>>, %arg3: memref<40x128xf32, #tpu.memory_space<vmem>>) attributes {dimension_semantics = [#tpu.dimension_semantics<parallel>], iteration_bounds = array<i64: 1>, scalar_prefetch = 0 : i64, scratch_operands = 0 : i64, tpu.core_type = #tpu.core_type<tc>, window_params = [{transform_indices = @transform_0, window_bounds = array<i64: 1, 4>}, {transform_indices = @transform_1, window_bounds = array<i64: 40, 512>}, {transform_indices = @transform_2, window_bounds = array<i64: 40, 128>}]} {
    %c0 = arith.constant 0 : index
    %c0_0 = arith.constant 0 : index
    %0 = memref.load %arg1[%c0, %c0_0] : memref<1x4xf32, #tpu.memory_space<smem>>
    %c0_1 = arith.constant 0 : index
    %c0_2 = arith.constant 0 : index
    %1 = vector.load %arg2[%c0_1, %c0_2] : memref<40x512xf32, #tpu.memory_space<vmem>>, vector<40x128xf32>
    %2 = vector.broadcast %0 : f32 to vector<40x128xf32>
    %3 = arith.mulf %2, %1 : vector<40x128xf32>
    %c0_3 = arith.constant 0 : index
    %c1 = arith.constant 1 : index
    %4 = memref.load %arg1[%c0_3, %c1] : memref<1x4xf32, #tpu.memory_space<smem>>
    %c0_4 = arith.constant 0 : index
    %c128 = arith.constant 128 : index
    %5 = vector.load %arg2[%c0_4, %c128] : memref<40x512xf32, #tpu.memory_space<vmem>>, vector<40x128xf32>
    %6 = vector.broadcast %4 : f32 to vector<40x128xf32>
    %7 = arith.mulf %6, %5 : vector<40x128xf32>
    %8 = arith.addf %3, %7 : vector<40x128xf32>
    %c0_5 = arith.constant 0 : index
    %c2 = arith.constant 2 : index
    %9 = memref.load %arg1[%c0_5, %c2] : memref<1x4xf32, #tpu.memory_space<smem>>
    %c0_6 = arith.constant 0 : index
    %c256 = arith.constant 256 : index
    %10 = vector.load %arg2[%c0_6, %c256] : memref<40x512xf32, #tpu.memory_space<vmem>>, vector<40x128xf32>
    %11 = vector.broadcast %9 : f32 to vector<40x128xf32>
    %12 = arith.mulf %11, %10 : vector<40x128xf32>
    %13 = arith.addf %8, %12 : vector<40x128xf32>
    %c0_7 = arith.constant 0 : index
    %c3 = arith.constant 3 : index
    %14 = memref.load %arg1[%c0_7, %c3] : memref<1x4xf32, #tpu.memory_space<smem>>
    %c0_8 = arith.constant 0 : index
    %c384 = arith.constant 384 : index
    %15 = vector.load %arg2[%c0_8, %c384] : memref<40x512xf32, #tpu.memory_space<vmem>>, vector<40x128xf32>
    %16 = vector.broadcast %14 : f32 to vector<40x128xf32>
    %17 = arith.mulf %16, %15 : vector<40x128xf32>
    %18 = arith.addf %13, %17 : vector<40x128xf32>
    %c0_9 = arith.constant 0 : index
    %c0_10 = arith.constant 0 : index
    %19 = vector.load %arg3[%c0_9, %c0_10] : memref<40x128xf32, #tpu.memory_space<vmem>>, vector<40x128xf32>
    tpu.vector_store %arg3[%c0_9, %c0_10], %18 {strides = array<i32>} : memref<40x128xf32, #tpu.memory_space<vmem>>, vector<40x128xf32>,
    return
  }
  func.func @transform_0(%arg0: i32) -> (i32, i32) {
    %c0_i32 = arith.constant 0 : i32
    %c0_i32_0 = arith.constant 0 : i32
    %c0_i32_1 = arith.constant 0 : i32
    return %c0_i32, %c0_i32_0 : i32, i32
  }
  func.func @transform_1(%arg0: i32) -> (i32, i32) {
    %c0_i32 = arith.constant 0 : i32
    %c0_i32_0 = arith.constant 0 : i32
    return %arg0, %c0_i32 : i32, i32
  }
  func.func @transform_2(%arg0: i32) -> (i32, i32) {
    %c0_i32 = arith.constant 0 : i32
    %c0_i32_0 = arith.constant 0 : i32
    return %arg0, %c0_i32 : i32, i32
  }
}

</mosaic_0001>

<bundles_post_ra>
// kernel: tpu_custom_call.1
= control target key start
LH: loop header
LB: loop body
LE: loop exit
PB: predicated region body
PF: predicated region fallthrough
CT: control target
= control target key end

     0   :  { %7 = vsyncpa [#allocation5], 0  ;;  %s236_s0 = inlined_call_operand.hbm [shape: f32[1,4], index: 0, kind: input, shape index: {}]   ;;  %s237_s1 = inlined_call_operand.hbm [shape: f32[40,512], index: 1, kind: input, shape index: {}]   ;;  %s238_s2 = inlined_call_operand.hbm [shape: f32[40,128], index: 2, kind: output, shape index: {}]  }
   0x1   :  { %8 = vsyncpa [#allocation3], 0 }
   0x2   :  { %9 = vsyncpa [#allocation4], 0  ;;  %s15_s11 = sshll.u32 %s236_s0, 4  ;;  %s23_s14 = sshll.u32 %s237_s1, 4  ;;  %s16_s11 = int_to_ptr.hbm [resolvable:$true] %s15_s11  ;;  %s24_s14 = int_to_ptr.hbm [resolvable:$true] %s23_s14 }
   0x3   :  { %s205_s15 = smov [#allocation2]   ;;  %s206_s16 = smov [#allocation6]  }
   0x4   :  { %18 = dma.hbm_to_smem %s16_s11, 16, %s205_s15, [#allocation5]  }
   0x5   :  { %s25_s17 = sshll.u32 %s206_s16, 4  ;;  %s207_s18 = smov 512   ;;  %s26_s17 = int_to_ptr.vmem [resolvable:$true] %s25_s17 }
   0x6   :  { %s208_s19 = smov 32  }
   0x7   :  { %31 = dma.hbm_to_vmem [thread:$0]  %s24_s14, 2560, %s26_s17, [#allocation3], %s207_s18, %s207_s18, %s208_s19  }
   0x8   :  { %199 = dma.done.wait [#allocation5], 16  }
   0x9   :  { %200 = vsyncadd [#allocation5], 4294967280 }
   0xa   :  { %201 = dma.done.wait [#allocation3], 2560  }
   0xb   :  { %202 = vsyncadd [#allocation3], 4294964736 }
   0xc   :  { %40 = sfence }
   0xd   :  { %s41_s0 = sld [smem:[#allocation2]]  ;;  %v42_v0 = vld [vmem:[#allocation6] sm:$0xff]  ;;  %v54_v3 = vld [vmem:[#allocation6 + $0x8] sm:$0xff]  ;;  %v71_v7 = vld [vmem:[#allocation6 + $0x10] sm:$0xff]  ;;  %s209_s1 = smov [#allocation7]  }
   0xe   :  { %s129_s20 = sld [smem:[#allocation2 + $0x1]]  ;;  %v43_v1 = vld [vmem:[#allocation6 + $0x20] sm:$0xff]  ;;  %v55_v4 = vld [vmem:[#allocation6 + $0x28] sm:$0xff]  ;;  %v72_v8 = vld [vmem:[#allocation6 + $0x30] sm:$0xff]  ;;  %s113_s23 = sshll.u32 %s209_s1, 4  ;;  %s114_s23 = int_to_ptr.vmem [resolvable:$true] %s113_s23 }
   0xf   :  { %s130_s21 = sld [smem:[#allocation2 + $0x2]]  ;;  %v44_v2 = vld [vmem:[#allocation6 + $0x40] sm:$0xff]  ;;  %v56_v5 = vld [vmem:[#allocation6 + $0x48] sm:$0xff]  ;;  %v73_v9 = vld [vmem:[#allocation6 + $0x50] sm:$0xff]  ;;  %s115_s26 = sshll.u32 %s238_s2, 4  ;;  %s116_s26 = int_to_ptr.hbm [resolvable:$true] %s115_s26 }
  0x10   :  { %s131_s22 = sld [smem:[#allocation2 + $0x3]]  ;;  %v88_v12 = vld [vmem:[#allocation6 + $0x18] sm:$0xff]  ;;  %v45_v21 = vld [vmem:[#allocation6 + $0x60] sm:$0xff]  ;;  %v57_v22 = vld [vmem:[#allocation6 + $0x68] sm:$0xff]  ;;  %s210_s27 = smov 128  }
  0x11   :  { %v89_v14 = vld [vmem:[#allocation6 + $0x38] sm:$0xff]  ;;  %v74_v27 = vld [vmem:[#allocation6 + $0x70] sm:$0xff]  ;;  %v46_v33 = vld [vmem:[#allocation6 + $0x80] sm:$0xff]  ;;  %s211_s28 = smov 8  }
  0x12   :  { %v90_v20 = vld [vmem:[#allocation6 + $0x58] sm:$0xff]  ;;  %v58_v34 = vld [vmem:[#allocation6 + $0x88] sm:$0xff]  ;;  %v75_v39 = vld [vmem:[#allocation6 + $0x90] sm:$0xff] }
  0x13   :  { %v47_v6 = vstv %s41_s0  ;;  %v91_v28 = vld [vmem:[#allocation6 + $0x78] sm:$0xff] }
  0x14   :  { %v48_v10 = vmul.f32 %v47_v6, %v42_v0  ;;  %v59_v11 = vstv %s129_s20  ;;  %v49_v13 = vmul.f32 %v47_v6, %v43_v1  ;;  %v50_v15 = vmul.f32 %v47_v6, %v44_v2  ;;  %v92_v44 = vld [vmem:[#allocation6 + $0x98] sm:$0xff] }
  0x15   :  { %v60_v16 = vmul.f32 %v59_v11, %v54_v3  ;;  %v76_v17 = vstv %s130_s21  ;;  %v61_v18 = vmul.f32 %v59_v11, %v55_v4  ;;  %v62_v19 = vmul.f32 %v59_v11, %v56_v5 }
  0x16   :  { %v77_v23 = vmul.f32 %v76_v17, %v71_v7  ;;  %v93_v24 = vstv %s131_s22  ;;  %v78_v25 = vmul.f32 %v76_v17, %v72_v8  ;;  %v79_v26 = vmul.f32 %v76_v17, %v73_v9 }
  0x17   :  { %v65_v29 = vadd.f32 %v60_v16, %v48_v10  ;;  %v94_v30 = vmul.f32 %v93_v24, %v88_v12  ;;  %v66_v31 = vadd.f32 %v61_v18, %v49_v13  ;;  %v95_v32 = vmul.f32 %v93_v24, %v89_v14 }
  0x18   :  { %v67_v35 = vadd.f32 %v62_v19, %v50_v15  ;;  %v96_v36 = vmul.f32 %v93_v24, %v90_v20  ;;  %v51_v37 = vmul.f32 %v47_v6, %v45_v21  ;;  %v63_v38 = vmul.f32 %v59_v11, %v57_v22 }
  0x19   :  { %v82_v40 = vadd.f32 %v77_v23, %v65_v29  ;;  %v83_v41 = vadd.f32 %v78_v25, %v66_v31  ;;  %v80_v42 = vmul.f32 %v76_v17, %v74_v27  ;;  %v97_v43 = vmul.f32 %v93_v24, %v91_v28 }
  0x1a   :  { %v84_v45 = vadd.f32 %v79_v26, %v67_v35  ;;  %v68_v46 = vadd.f32 %v63_v38, %v51_v37  ;;  %v52_v47 = vmul.f32 %v47_v6, %v46_v33  ;;  %v64_v48 = vmul.f32 %v59_v11, %v58_v34 }
  0x1b   :  { %v99_v49 = vadd.f32 %v94_v30, %v82_v40  ;;  %v100_v50 = vadd.f32 %v95_v32, %v83_v41  ;;  %v81_v51 = vmul.f32 %v76_v17, %v75_v39  ;;  %v98_v55 = vmul.f32 %v93_v24, %v92_v44 }
  0x1c   :  { %v101_v52 = vadd.f32 %v96_v36, %v84_v45  ;;  %v85_v53 = vadd.f32 %v80_v42, %v68_v46  ;;  %v69_v54 = vadd.f32 %v64_v48, %v52_v47 }
  0x1d   :  { %104 = vst [vmem:[#allocation7] sm:$0xff] %v99_v49 }
  0x1e   :  { %105 = vst [vmem:[#allocation7 + $0x8] sm:$0xff] %v100_v50  ;;  %v102_v56 = vadd.f32 %v97_v43, %v85_v53  ;;  %v86_v57 = vadd.f32 %v81_v51, %v69_v54 }
  0x1f   :  { %106 = vst [vmem:[#allocation7 + $0x10] sm:$0xff] %v101_v52 }
  0x20   :  { %107 = vst [vmem:[#allocation7 + $0x18] sm:$0xff] %v102_v56  ;;  %v103_v58 = vadd.f32 %v98_v55, %v86_v57 }
  0x22   :  { %108 = vst [vmem:[#allocation7 + $0x20] sm:$0xff] %v103_v58 }
  0x23   :  { %121 = dma.vmem_to_hbm [thread:$0]  %s114_s23, 640, %s116_s26, [#allocation4], %s210_s27, %s210_s27, %s211_s28  }
  0x24   :  { %203 = dma.done.wait [#allocation4], 640  }
  0x25   :  { %204 = vsyncadd [#allocation4], 4294966656 }
  0x26   :  { %126 = vsyncpa [#allocation3], 1 }
  0x27   :  { %127 = vsyncpa [#allocation4], 1 }
  0x28   :  { %128 = vsyncpa [#allocation5], 1 }

</bundles_post_ra>
